<compile_context>
chip_gen: v6e
topology: v6e:2x2x1
jax: 0.10.0
libtpu: 0.0.40
codegen_flags: <defaults>
</compile_context>

<pallas_src>
import functools

import jax
import jax.numpy as jnp
from jax.experimental import pallas as pl
from jax.experimental.pallas import tpu as pltpu


def _round_up(x, m):
    return ((x + m - 1) // m) * m


def _choose_tiles(batch, input_size, label_size):
    # Conservative tile sizes: fit comfortably in v7x's 64 MiB VMEM (double
    # buffered) while staying 128-aligned for the MXU / lane-dense stores.
    tm = min(_round_up(batch, 8), 256)
    tn = min(_round_up(label_size, 128), 256)
    tk = min(_round_up(input_size, 128), 512)
    return tm, tn, tk


def _linear_sigmoid_kernel(x_ref, w_ref, b_ref, o_ref, acc_ref):
    k = pl.program_id(2)

    @pl.when(k == 0)
    def _():
        acc_ref[...] = jnp.zeros_like(acc_ref)

    # bf16 x bf16 -> f32 accumulate on the MXU.
    acc_ref[...] += jnp.dot(x_ref[...], w_ref[...],
                            preferred_element_type=jnp.float32)

    # Epilogue only once per (i, j) output tile, on the last K step.
    @pl.when(k == pl.num_programs(2) - 1)
    def _():
        y = acc_ref[...] + b_ref[...]          # (TM, TN) + (1, TN) broadcast, f32
        o_ref[...] = jax.nn.sigmoid(y).astype(o_ref.dtype)


@functools.partial(jax.jit, static_argnames=())
def linear_mlc_forward(doc_rep, weight_t, bias):
    """doc_rep: (batch, *features); weight_t: (input_size, label_size); bias: (label_size,)."""
    batch = doc_rep.shape[0]
    x = doc_rep.reshape(batch, -1)             # flatten like .view(batch, -1)
    input_size, label_size = weight_t.shape
    assert x.shape[1] == input_size

    tm, tn, tk = _choose_tiles(batch, input_size, label_size)
    pad_m = _round_up(batch, tm)
    pad_k = _round_up(input_size, tk)
    pad_n = _round_up(label_size, tn)

    # bf16 inputs/weights (mem-bound on W); zero padding keeps the matmul exact.
    xp = jnp.pad(x.astype(jnp.bfloat16),
                 ((0, pad_m - batch), (0, pad_k - input_size)))
    wp = jnp.pad(weight_t.astype(jnp.bfloat16),
                 ((0, pad_k - input_size), (0, pad_n - label_size)))
    bp = jnp.pad(bias.astype(jnp.float32).reshape(1, label_size),
                 ((0, 0), (0, pad_n - label_size)))

    grid = (pad_m // tm, pad_n // tn, pad_k // tk)

    flops = 2 * pad_m * pad_k * pad_n
    bytes_accessed = (xp.size * 2 + wp.size * 2 + bp.size * 4 + pad_m * pad_n * 4)
    cost = pl.CostEstimate(flops=flops,
                           transcendentals=pad_m * pad_n,
                           bytes_accessed=bytes_accessed)

    out = pl.pallas_call(
        _linear_sigmoid_kernel,
        out_shape=jax.ShapeDtypeStruct((pad_m, pad_n), jnp.float32),
        grid_spec=pltpu.PrefetchScalarGridSpec(
            num_scalar_prefetch=0,
            grid=grid,
            in_specs=[
                pl.BlockSpec((tm, tk), lambda i, j, k: (i, k)),   # activations
                pl.BlockSpec((tk, tn), lambda i, j, k: (k, j)),   # weight
                pl.BlockSpec((1, tn), lambda i, j, k: (0, j)),    # bias
            ],
            out_specs=pl.BlockSpec((tm, tn), lambda i, j, k: (i, j)),
            scratch_shapes=[pltpu.VMEM((tm, tn), jnp.float32)],
        ),
        compiler_params=pltpu.CompilerParams(
            dimension_semantics=("parallel", "parallel", "arbitrary"),
            vmem_limit_bytes=64 * 1024 * 1024,
        ),
        cost_estimate=cost,
    )(xp, wp, bp)

    # Strip padding back to the logical shape.
    return out[:batch, :label_size]


def _reference(doc_rep, weight_t, bias):
    batch = doc_rep.shape[0]
    x = doc_rep.reshape(batch, -1).astype(jnp.float32)
    return jax.nn.sigmoid(x @ weight_t.astype(jnp.float32) + bias.astype(jnp.float32))


if __name__ == "__main__":
    key = jax.random.PRNGKey(0)
    k_x, k_w, k_b = jax.random.split(key, 3)

    # doc_rep: (batch, 4, 16, 16) -> flattened input_size = 1024, label_size = 32.
    batch, f1, f2, f3 = 2, 4, 16, 16
    input_size = f1 * f2 * f3
    label_size = 32

    doc_rep = jax.random.normal(k_x, (batch, f1, f2, f3), dtype=jnp.float32)

    # "Linear" params; PyTorch stores weight as [label, input] — we keep the
    # transposed [input, label] layout so the kernel does a plain x @ W.
    bound = 1.0 / jnp.sqrt(input_size)
    weight_t = jax.random.uniform(k_w, (input_size, label_size),
                                  minval=-bound, maxval=bound, dtype=jnp.float32)
    bias = jax.random.uniform(k_b, (label_size,),
                              minval=-bound, maxval=bound, dtype=jnp.float32)

    out = linear_mlc_forward(doc_rep, weight_t, bias)
    out = jax.block_until_ready(out)

    ref = _reference(doc_rep, weight_t, bias)
    assert out.shape == (batch, label_size)
    # bf16 matmul vs f32 reference: allow modest tolerance.
    assert jnp.allclose(out, ref, atol=2e-2, rtol=2e-2), "mismatch vs reference"

    print("KERNEL_OK")
</pallas_src>

<mosaic_0001>
module attributes {stable_mosaic.version = 11 : i64} {
  func.func @_linear_sigmoid_kernel(%arg0: i32, %arg1: i32, %arg2: i32, %arg3: memref<8x512xbf16, #tpu.memory_space<vmem>>, %arg4: memref<512x128xbf16, #tpu.memory_space<vmem>>, %arg5: memref<1x128xf32, #tpu.memory_space<vmem>>, %arg6: memref<8x128xf32, #tpu.memory_space<vmem>>, %arg7: memref<8x128xf32, #tpu.memory_space<vmem>>) attributes {dimension_semantics = [#tpu.dimension_semantics<parallel>, #tpu.dimension_semantics<parallel>, #tpu.dimension_semantics<arbitrary>], iteration_bounds = array<i64: 1, 1, 2>, scalar_prefetch = 0 : i64, scratch_operands = 1 : i64, tpu.core_type = #tpu.core_type<tc>, window_params = [{transform_indices = @transform_0, window_bounds = array<i64: 8, 512>}, {transform_indices = @transform_1, window_bounds = array<i64: 512, 128>}, {transform_indices = @transform_2, window_bounds = array<i64: 1, 128>}, {transform_indices = @transform_3, window_bounds = array<i64: 8, 128>}]} {
    %c0_i32 = arith.constant 0 : i32
    %0 = arith.cmpi eq, %arg2, %c0_i32 : i32
    %1 = arith.extui %0 : i1 to i32
    %c0_i32_0 = arith.constant 0 : i32
    %2 = arith.cmpi ne, %1, %c0_i32_0 : i32
    scf.if %2 {
      %cst_9 = arith.constant 0.000000e+00 : f32
      %12 = vector.broadcast %cst_9 : f32 to vector<8x128xf32>
      %c0_10 = arith.constant 0 : index
      %c0_11 = arith.constant 0 : index
      %13 = vector.load %arg7[%c0_10, %c0_11] : memref<8x128xf32, #tpu.memory_space<vmem>>, vector<8x128xf32>
      tpu.vector_store %arg7[%c0_10, %c0_11], %12 {strides = array<i32>} : memref<8x128xf32, #tpu.memory_space<vmem>>, vector<8x128xf32>,
    } else {
    }
    %c0 = arith.constant 0 : index
    %c0_1 = arith.constant 0 : index
    %3 = vector.load %arg7[%c0, %c0_1] : memref<8x128xf32, #tpu.memory_space<vmem>>, vector<8x128xf32>
    %c0_2 = arith.constant 0 : index
    %c0_3 = arith.constant 0 : index
    %4 = vector.load %arg3[%c0_2, %c0_3] : memref<8x512xbf16, #tpu.memory_space<vmem>>, vector<8x512xbf16>
    %c0_4 = arith.constant 0 : index
    %c0_5 = arith.constant 0 : index
    %5 = vector.load %arg4[%c0_4, %c0_5] : memref<512x128xbf16, #tpu.memory_space<vmem>>, vector<512x128xbf16>
    %cst = arith.constant dense<0.000000e+00> : vector<8x128xf32>
    %6 = tpu.matmul %4, %5, %cst {dimension_numbers = #tpu.dot_dimension_numbers<[1], [0], [0], [1], [0, 0, 1, 1], [], []>} : vector<8x512xbf16>, vector<512x128xbf16>, vector<8x128xf32> -> vector<8x128xf32>
    %7 = arith.addf %3, %6 : vector<8x128xf32>
    %c0_6 = arith.constant 0 : index
    %c0_7 = arith.constant 0 : index
    %8 = vector.load %arg7[%c0_6, %c0_7] : memref<8x128xf32, #tpu.memory_space<vmem>>, vector<8x128xf32>
    tpu.vector_store %arg7[%c0_6, %c0_7], %7 {strides = array<i32>} : memref<8x128xf32, #tpu.memory_space<vmem>>, vector<8x128xf32>,
    %c1_i32 = arith.constant 1 : i32
    %9 = arith.cmpi eq, %arg2, %c1_i32 : i32
    %10 = arith.extui %9 : i1 to i32
    %c0_i32_8 = arith.constant 0 : i32
    %11 = arith.cmpi ne, %10, %c0_i32_8 : i32
    scf.if %11 {
      %c0_9 = arith.constant 0 : index
      %c0_10 = arith.constant 0 : index
      %12 = vector.load %arg7[%c0_9, %c0_10] : memref<8x128xf32, #tpu.memory_space<vmem>>, vector<8x128xf32>
      %c0_11 = arith.constant 0 : index
      %c0_12 = arith.constant 0 : index
      %13 = vector.load %arg5[%c0_11, %c0_12] : memref<1x128xf32, #tpu.memory_space<vmem>>, vector<1x128xf32>
      %14 = vector.broadcast %13 : vector<1x128xf32> to vector<8x128xf32>
      %15 = arith.addf %12, %14 : vector<8x128xf32>
      %16 = arith.negf %15 : vector<8x128xf32>
      %17 = math.exp %16 : vector<8x128xf32>
      %cst_13 = arith.constant 1.000000e+00 : f32
      %18 = vector.broadcast %cst_13 : f32 to vector<8x128xf32>
      %19 = arith.addf %18, %17 : vector<8x128xf32>
      %20 = arith.divf %18, %19 : vector<8x128xf32>
      %c0_14 = arith.constant 0 : index
      %c0_15 = arith.constant 0 : index
      %21 = vector.load %arg6[%c0_14, %c0_15] : memref<8x128xf32, #tpu.memory_space<vmem>>, vector<8x128xf32>
      tpu.vector_store %arg6[%c0_14, %c0_15], %20 {strides = array<i32>} : memref<8x128xf32, #tpu.memory_space<vmem>>, vector<8x128xf32>,
    } else {
    }
    return
  }
  func.func @transform_0(%arg0: i32, %arg1: i32, %arg2: i32) -> (i32, i32) {
    %c0_i32 = arith.constant 0 : i32
    return %arg0, %arg2 : i32, i32
  }
  func.func @transform_1(%arg0: i32, %arg1: i32, %arg2: i32) -> (i32, i32) {
    %c0_i32 = arith.constant 0 : i32
    return %arg2, %arg1 : i32, i32
  }
  func.func @transform_2(%arg0: i32, %arg1: i32, %arg2: i32) -> (i32, i32) {
    %c0_i32 = arith.constant 0 : i32
    %c0_i32_0 = arith.constant 0 : i32
    return %c0_i32, %arg1 : i32, i32
  }
  func.func @transform_3(%arg0: i32, %arg1: i32, %arg2: i32) -> (i32, i32) {
    %c0_i32 = arith.constant 0 : i32
    return %arg0, %arg1 : i32, i32
  }
}

</mosaic_0001>

<bundles_post_ra>
// kernel: linear_mlc_forward.1
= control target key start
LH: loop header
LB: loop body
LE: loop exit
PB: predicated region body
PF: predicated region fallthrough
CT: control target
= control target key end

     0   :  { %s951_s12 = smov 0   ;;  %s953_s13 = smov 0   ;;  %s1034_s0 = inlined_call_operand.vmem [shape: bf16[8,1024], index: 0, kind: input, shape index: {}]   ;;  %s1035_s1 = inlined_call_operand.vmem [shape: bf16[1024,128], index: 1, kind: input, shape index: {}]   ;;  %s1036_s2 = inlined_call_operand.vmem [shape: f32[1,128], index: 2, kind: input, shape index: {}]   ;;  %s1037_s3 = inlined_call_operand.vmem [shape: f32[8,128], index: 3, kind: output, shape index: {}]  }
   0x1   :  { %s955_s14 = smov 0  }
   0x2 LB: > { %s25_s15 = sadd.s32 1, %s924_s13  ;;  %p749_p0 = scmp.ge.s32.totalorder %s928_s14, 1  ;;  %s928_s14 = sphi %s955_s14, %s13_s14   ;;  %s924_s13 = sphi %s953_s13, %s1039_s13   ;;  %s920_s12 = sphi %s951_s12, %s1038_s12  }
   0x3   : > { %p26_p1 = scmp.ge.s32.totalorder %s25_s15, 2  ;;  %p189_p2 = scmp.lt.s32.totalorder %s928_s14, 3 }
   0x5   : > { %s1041_s15 = smov (%p26_p1, %s25_s15), 0  ;;  %p190_p3 = pnand %p749_p0, %p189_p2 }
   0x6   : > { %s750_s16 = sshll.u32 (!%p190_p3), %s920_s12, 2  ;;  %s752_s17 = sshll.u32 (!%p190_p3), %s920_s12, 6 }
   0x7   : > { %193 = sbr.rel (%p190_p3) target bundleno = 301 (0x12d), region = 32  ;;  %p233_p4 = scmp.lt.s32.totalorder (!%p190_p3), %s750_s16, 7 }
   0x8   : > { %p241_p5 = scmp.lt.s32.totalorder (!%p190_p3), %s752_s17, 127  ;;  %p754_p6 = scmp.ne.s32.totalorder (!%p190_p3), %s920_s12, 0 }
   0xc   : > { %s1043_s16 = smov (!%p233_p4, %s750_s16), 7  ;;  %s1045_s17 = smov (!%p241_p5, %s752_s17), 127 }
   0xd   : > { %s751_s18 = sshll.u32 %s1043_s16, 2  ;;  %s753_s22 = sshll.u32 %s1045_s17, 2 }
   0xe   : > { %s976_s21 = scalar_lea.vmem %s1034_s0, %s751_s18  ;;  %s981_s25 = scalar_lea.vmem %s1035_s1, %s753_s22 }
   0xf   : > { %263 = sbr.rel (%p754_p6) target bundleno = 22 (0x16), region = 36 }
  0x14   : > { %v930_v0 = vmov 0.0  }
  0x15   : > { %264 = vst [vmem:[#allocation2] sm:$0xff] %v930_v0 }
  0x16 PF: > { %v866_v1 = vld [vmem:[%s981_s25 + $0x78] sm:$0xff]   ;;  %v870_v5 = vld [vmem:[%s981_s25 + $0x70] sm:$0xff]   ;;  %v874_v9 = vld [vmem:[%s981_s25 + $0x68] sm:$0xff]   ;;  %p791_p7 = scmp.ne.s32.totalorder %s920_s12, 1 }
  0x17   : > { %v867_v2 = vld [vmem:[%s981_s25 + $0xf8] sm:$0xff]   ;;  %797 = vmatprep.subr.bf16.mxu0 %v866_v1  ;;  %v871_v6 = vld [vmem:[%s981_s25 + $0xf0] sm:$0xff]   ;;  %v875_v10 = vld [vmem:[%s981_s25 + $0xe8] sm:$0xff]  }
  0x18   : > { %v868_v3 = vld [vmem:[%s981_s25 + $0x38] sm:$0xff]   ;;  %819 = vmatprep.subr.bf16.mxu1 %v867_v2  ;;  %v872_v7 = vld [vmem:[%s981_s25 + $0x30] sm:$0xff]   ;;  %v876_v11 = vld [vmem:[%s981_s25 + $0x28] sm:$0xff]  }
  0x19   : > { %v869_v4 = vld [vmem:[%s981_s25 + $0xb8] sm:$0xff]   ;;  %798 = vmatpush3.bf16.msra.mxu0 %v868_v3  ;;  %v873_v8 = vld [vmem:[%s981_s25 + $0xb0] sm:$0xff]   ;;  %v877_v12 = vld [vmem:[%s981_s25 + $0xa8] sm:$0xff]  }
  0x1a   : > { %820 = vmatpush3.bf16.msra.mxu1 %v869_v4  ;;  %799 = vmatprep.subr.bf16.mxu0 %v870_v5  ;;  %v878_v13 = vld [vmem:[%s981_s25 + $0x60] sm:$0xff]   ;;  %v882_v17 = vld [vmem:[%s981_s25 + $0x58] sm:$0xff]   ;;  %v886_v21 = vld [vmem:[%s981_s25 + $0x50] sm:$0xff]  }
  0x1b   : > { %821 = vmatprep.subr.bf16.mxu1 %v871_v6  ;;  %v879_v14 = vld [vmem:[%s981_s25 + $0xe0] sm:$0xff]   ;;  %v883_v18 = vld [vmem:[%s981_s25 + $0xd8] sm:$0xff]   ;;  %v887_v22 = vld [vmem:[%s981_s25 + $0xd0] sm:$0xff]  }
  0x1c   : > { %v880_v15 = vld [vmem:[%s981_s25 + $0x20] sm:$0xff]   ;;  %v884_v19 = vld [vmem:[%s981_s25 + $0x18] sm:$0xff]   ;;  %v888_v23 = vld [vmem:[%s981_s25 + $0x10] sm:$0xff]  }
  0x1d   : > { %800 = vmatpush3.bf16.msra.mxu0 %v872_v7  ;;  %v881_v16 = vld [vmem:[%s981_s25 + $0xa0] sm:$0xff]   ;;  %v885_v20 = vld [vmem:[%s981_s25 + $0x98] sm:$0xff]   ;;  %v889_v24 = vld [vmem:[%s981_s25 + $0x90] sm:$0xff]  }
  0x1e   : > { %822 = vmatpush3.bf16.msra.mxu1 %v873_v8  ;;  %801 = vmatprep.subr.bf16.mxu0 %v874_v9  ;;  %v890_v25 = vld [vmem:[%s981_s25 + $0x48] sm:$0xff]   ;;  %v894_v29 = vld [vmem:[%s981_s25 + $0x40] sm:$0xff]  }
  0x1f   : > { %823 = vmatprep.subr.bf16.mxu1 %v875_v10  ;;  %v891_v26 = vld [vmem:[%s981_s25 + $0xc8] sm:$0xff]   ;;  %v895_v30 = vld [vmem:[%s981_s25 + $0xc0] sm:$0xff]  }
  0x20   : > { %v892_v27 = vld [vmem:[%s981_s25 + $0x8] sm:$0xff]   ;;  %v896_v31 = vld [vmem:[%s981_s25] sm:$0xff]  }
  0x21   : > { %802 = vmatpush3.bf16.msra.mxu0 %v876_v11  ;;  %v893_v28 = vld [vmem:[%s981_s25 + $0x88] sm:$0xff]   ;;  %v897_v32 = vld [vmem:[%s981_s25 + $0x80] sm:$0xff]  }
  0x22   : > { %824 = vmatpush3.bf16.msra.mxu1 %v877_v12  ;;  %803 = vmatprep.subr.bf16.mxu0 %v878_v13  ;;  %v266_v33 = vld [vmem:[%s976_s21] sm:$0xff]  ;;  %v267_v34 = vld [vmem:[%s976_s21 + $0x8] sm:$0xff] }
  0x23   : > { %825 = vmatprep.subr.bf16.mxu1 %v879_v14  ;;  %v755_v35 = vcombine.low %v266_v33, %v266_v33  ;;  %v756_v36 = vcombine.high %v266_v33, %v266_v33  ;;  %v757_v37 = vcombine.low %v267_v34, %v267_v34  ;;  %v758_v38 = vcombine.high %v267_v34, %v267_v34  ;;  %v265_v45 = vld [vmem:[#allocation2] sm:$0xff] }
  0x25   : > { %804 = vmatpush3.bf16.msra.mxu0 %v880_v15  ;;  %570 = vmatprep.mubr.bf16.mxu0 %v756_v36 }
  0x26   : > { %826 = vmatpush3.bf16.msra.mxu1 %v881_v16  ;;  %805 = vmatprep.subr.bf16.mxu0 %v882_v17 }
  0x27   : > { %827 = vmatprep.subr.bf16.mxu1 %v883_v18  ;;  %610 = vmatprep.mubr.bf16.mxu1 %v758_v38 }
  0x29   : > { %806 = vmatpush3.bf16.msra.mxu0 %v884_v19 }
  0x2a   : > { %828 = vmatpush3.bf16.msra.mxu1 %v885_v20  ;;  %807 = vmatprep.subr.bf16.mxu0 %v886_v21 }
  0x2b   : > { %829 = vmatprep.subr.bf16.mxu1 %v887_v22 }
  0x2d   : > { %808 = vmatpush3.bf16.msra.mxu0 %v888_v23 }
  0x2e   : > { %830 = vmatpush3.bf16.msra.mxu1 %v889_v24  ;;  %809 = vmatprep.subr.bf16.mxu0 %v890_v25 }
  0x2f   : > { %831 = vmatprep.subr.bf16.mxu1 %v891_v26 }
  0x31   : > { %810 = vmatpush3.bf16.msra.mxu0 %v892_v27 }
  0x32   : > { %832 = vmatpush3.bf16.msra.mxu1 %v893_v28  ;;  %811 = vmatprep.subr.bf16.mxu0 %v894_v29 }
  0x33   : > { %833 = vmatprep.subr.bf16.mxu1 %v895_v30 }
  0x35   : > { %812 = vmatpush3.bf16.msra.mxu0 %v896_v31 }
  0x36   : > { %834 = vmatpush3.bf16.msra.mxu1 %v897_v32 }
  0x38   : > { %571 = vmatmul.mubr.bf16.vlgmr.msra.gmra.mxu0 %v755_v35 }
  0x39   : > { %611 = vmatmul.mubr.bf16.vlgmr.msra.gmra.mxu1 %v757_v37 }
  0xf8   : > { %v813_v39 = vpop.f32.mrf.mxu0 }
  0xf9   : > { %v835_v40 = vpop.f32.mrf.mxu1 }
  0xfa   : > { %v814_v41 = vpop.f32.mrf.mxu0 }
  0xfb   : > { %v836_v42 = vpop.f32.mrf.mxu1  ;;  %v815_v43 = vadd.f32 %v814_v41, %v813_v39 }
  0xfc   : > { %v837_v44 = vadd.f32 %v836_v42, %v835_v40  ;;  %v816_v46 = vpop.f32.mrf.mxu0 }
  0xfd   : > { %v838_v47 = vpop.f32.mrf.mxu1 }
  0xfe   : > { %v613_v48 = vadd.f32 %v837_v44, %v815_v43  ;;  %v817_v49 = vpop.f32.mrf.mxu0  ;;  %623 = sbr.rel (%p791_p7) target bundleno = 301 (0x12d), region = 40 }
  0xff   : > { %v839_v50 = vpop.f32.mrf.mxu1 }
 0x100   : > { %v618_v51 = vadd.f32 %v613_v48, %v265_v45 }
 0x102   : > { %619 = vst [vmem:[#allocation2] sm:$0xff] %v618_v51 }
 0x103   : > { %v792_v53 = vld [vmem:[%s1036_s2] ss:$0 sm:$0xff] }
 0x109   : > { %v624_v52 = vld [vmem:[#allocation2] sm:$0xff] }
 0x10a   : > { %v632_v54 = vadd.f32 %v792_v53, %v624_v52 }
 0x10c   : > { %v793_v55 = vmul.f32 -1.442695, %v632_v54 }
 0x10e   : > { %902 = vpow2.f32 %v793_v55 }
 0x11b   : > { %v903_v56 = vpop.eup %902 }
 0x11c   : > { %v636_v57 = vadd.f32 1.0, %v903_v56 }
 0x11e   : > { %904 = vrcp.f32 %v636_v57 }
 0x12b   : > { %v905_v58 = vpop.eup %904 }
 0x12c   : > { %639 = vst [vmem:[%s1037_s3] sm:$0xff] %v905_v58 }
 0x12d PF: > { %s13_s14 = sadd.s32 1, %s928_s14   ;;  %s1038_s12 = smov %s924_s13 }
 0x12e   : > { %p10_p8 = scmp.ge.s32.totalorder %s13_s14, 4   ;;  %s1039_s13 = smov %s1041_s15 }
 0x130   :  { %12 = sbr.rel (!%p10_p8) target bundleno = 2 (0x2), region = 76 }

</bundles_post_ra>
